<compile_context>
chip_gen: v6e
topology: v6e:2x2x1
jax: 0.10.0
libtpu: 0.0.40
codegen_flags: <defaults>
</compile_context>

<pallas_src>
import functools
import math

import jax
import jax.numpy as jnp
from jax.experimental import pallas as pl
from jax.experimental.pallas import tpu as pltpu


# ----------------------------------------------------------------------------
# Kernel 1: input projection + zero future-padding + positional encoding
# ----------------------------------------------------------------------------
def _embed_kernel(x_ref, wi_ref, bi_ref, pe_ref, o_ref):
    # x_ref: (S, input_dim), wi: (input_dim, D), bi: (1, D), pe/o: (T, D)
    S = x_ref.shape[0]
    T, D = o_ref.shape
    proj = (
        jnp.dot(x_ref[...], wi_ref[...], preferred_element_type=jnp.float32)
        + bi_ref[...]
    )                                                     # (S, D)
    pad = jnp.zeros((T - S, D), dtype=jnp.float32)        # future positions are zeros
    o_ref[...] = jnp.concatenate([proj, pad], axis=0) + pe_ref[...]


def embed(x, wi, bi2d, pe_t):
    """(input_linear(x) ++ zeros(p)) + pe[:T], computed per batch element."""
    B, S, input_dim = x.shape
    T, D = pe_t.shape
    return pl.pallas_call(
        _embed_kernel,
        out_shape=jax.ShapeDtypeStruct((B, T, D), jnp.float32),
        grid=(B,),
        in_specs=[
            pl.BlockSpec((pl.Squeezed(), S, input_dim), lambda b: (b, 0, 0)),
            pl.BlockSpec((input_dim, D), lambda b: (0, 0)),
            pl.BlockSpec((1, D), lambda b: (0, 0)),
            pl.BlockSpec((T, D), lambda b: (0, 0)),
        ],
        out_specs=pl.BlockSpec((pl.Squeezed(), T, D), lambda b: (b, 0, 0)),
        compiler_params=pltpu.CompilerParams(dimension_semantics=("parallel",)),
    )(x, wi, bi2d, pe_t)


# ----------------------------------------------------------------------------
# Kernel 2: one fully fused TransformerEncoderLayer (post-norm, ReLU FFN, causal)
# ----------------------------------------------------------------------------
def _encoder_layer_kernel(h_ref, wqkv_t_ref, bqkv_t_ref, wo_ref, bo_ref,
                          g1_ref, be1_ref, w1_ref, b1_ref, w2_ref, b2_ref,
                          g2_ref, be2_ref, o_ref, *, nhead, eps):
    h = h_ref[...]                                        # (T, D) for one batch element
    T, D = h.shape
    Dh = D // nhead
    scale = 1.0 / math.sqrt(Dh)

    # --- fused QKV projection, produced transposed: qkv_t[r, t] = (h @ Wqkv + bqkv)[t, r]
    # Keeping heads on the sublane (row) axis makes every per-head slice 8-aligned.
    qkv_t = jax.lax.dot_general(
        wqkv_t_ref[...], h, (((1,), (1,)), ((), ())),
        preferred_element_type=jnp.float32,
    ) + bqkv_t_ref[...]                                   # (3D, T)

    # causal mask == torch.triu(full(-inf), diagonal=1): mask out col > row
    row = jax.lax.broadcasted_iota(jnp.int32, (T, T), 0)
    col = jax.lax.broadcasted_iota(jnp.int32, (T, T), 1)
    causal = col > row

    # --- multi-head causal attention + output projection, accumulated per head:
    #     concat_h(o_h) @ Wo  ==  sum_h  o_h @ Wo[h*Dh:(h+1)*Dh, :]
    attn_out = bo_ref[...]                                # (1, D), broadcasts over rows
    for hh in range(nhead):
        lo = hh * Dh
        q_t = qkv_t[lo:lo + Dh, :]                        # (Dh, T)
        k_t = qkv_t[D + lo:D + lo + Dh, :]                # (Dh, T)
        v_t = qkv_t[2 * D + lo:2 * D + lo + Dh, :]        # (Dh, T)
        s = jax.lax.dot_general(                          # q @ k^T  -> (T, T)
            q_t, k_t, (((0,), (0,)), ((), ())),
            preferred_element_type=jnp.float32,
        ) * scale
        s = jnp.where(causal, -1e30, s)
        s = s - jnp.max(s, axis=-1, keepdims=True)
        p = jnp.exp(s)
        p = p * pl.reciprocal(jnp.sum(p, axis=-1, keepdims=True), approx=True)
        o_h = jax.lax.dot_general(                        # p @ v    -> (T, Dh)
            p, v_t, (((1,), (1,)), ((), ())),
            preferred_element_type=jnp.float32,
        )
        attn_out = attn_out + jnp.dot(
            o_h, wo_ref[lo:lo + Dh, :], preferred_element_type=jnp.float32
        )                                                 # (T, D)

    # --- residual + LayerNorm 1 (post-norm, eps matches PyTorch 1e-5)
    z = h + attn_out
    mean = jnp.mean(z, axis=-1, keepdims=True)
    var = jnp.mean((z - mean) ** 2, axis=-1, keepdims=True)
    h1 = (z - mean) * jax.lax.rsqrt(var + eps) * g1_ref[...] + be1_ref[...]

    # --- feed-forward (ReLU = TransformerEncoderLayer default activation)
    f = jnp.dot(h1, w1_ref[...], preferred_element_type=jnp.float32) + b1_ref[...]
    f = jnp.maximum(f, 0.0)
    ff = jnp.dot(f, w2_ref[...], preferred_element_type=jnp.float32) + b2_ref[...]

    # --- residual + LayerNorm 2
    z2 = h1 + ff
    mean2 = jnp.mean(z2, axis=-1, keepdims=True)
    var2 = jnp.mean((z2 - mean2) ** 2, axis=-1, keepdims=True)
    o_ref[...] = (z2 - mean2) * jax.lax.rsqrt(var2 + eps) * g2_ref[...] + be2_ref[...]


def encoder_layer(h, lp, *, nhead, eps=1e-5):
    """One fused TransformerEncoderLayer over a (B, T, D) hidden state."""
    B, T, D = h.shape
    F = lp["W1"].shape[1]

    def _rep(shape):  # replicated (weight) operand: same full block every grid step
        return pl.BlockSpec(shape, lambda b: (0,) * len(shape))

    h_spec = pl.BlockSpec((pl.Squeezed(), T, D), lambda b: (b, 0, 0))
    return pl.pallas_call(
        functools.partial(_encoder_layer_kernel, nhead=nhead, eps=eps),
        out_shape=jax.ShapeDtypeStruct((B, T, D), jnp.float32),
        grid=(B,),
        in_specs=[
            h_spec,
            _rep((3 * D, D)), _rep((3 * D, 1)),    # WqkvT, bqkvT
            _rep((D, D)), _rep((1, D)),            # Wo, bo
            _rep((1, D)), _rep((1, D)),            # g1, be1
            _rep((D, F)), _rep((1, F)),            # W1, b1
            _rep((F, D)), _rep((1, D)),            # W2, b2
            _rep((1, D)), _rep((1, D)),            # g2, be2
        ],
        out_specs=h_spec,
        compiler_params=pltpu.CompilerParams(dimension_semantics=("parallel",)),
    )(h, lp["WqkvT"], lp["bqkvT"], lp["Wo"], lp["bo"], lp["g1"], lp["be1"],
      lp["W1"], lp["b1"], lp["W2"], lp["b2"], lp["g2"], lp["be2"])


# ----------------------------------------------------------------------------
# Model: parameters, positional encoding, forward pass
# ----------------------------------------------------------------------------
def make_positional_encoding(max_len, d_model):
    position = jnp.arange(max_len, dtype=jnp.float32)[:, None]
    div_term = jnp.exp(
        jnp.arange(0, d_model, 2, dtype=jnp.float32) * (-math.log(10000.0) / d_model)
    )
    pe = jnp.zeros((max_len, d_model), dtype=jnp.float32)
    pe = pe.at[:, 0::2].set(jnp.sin(position * div_term))
    pe = pe.at[:, 1::2].set(jnp.cos(position * div_term))
    return pe  # (max_len, d_model)


def init_params(key, input_dim, d_model, nhead, num_layers, dim_feedforward):
    def nrm(k, shape, scale=0.05):
        return scale * jax.random.normal(k, shape, dtype=jnp.float32)

    keys = iter(jax.random.split(key, 4 + num_layers * 8))
    params = {
        "Wi": nrm(next(keys), (input_dim, d_model)),
        "bi": nrm(next(keys), (1, d_model)),
        "Wout": nrm(next(keys), (d_model, input_dim)),
        "bout": nrm(next(keys), (input_dim,)),
        "layers": [],
    }
    for _ in range(num_layers):
        lp = {
            # merged QKV weight, stored transposed: (3*d_model, d_model)
            "WqkvT": nrm(next(keys), (3 * d_model, d_model)),
            "bqkvT": nrm(next(keys), (3 * d_model, 1)),
            "Wo": nrm(next(keys), (d_model, d_model)),
            "bo": nrm(next(keys), (1, d_model)),
            "g1": jnp.ones((1, d_model), jnp.float32),
            "be1": jnp.zeros((1, d_model), jnp.float32),
            "W1": nrm(next(keys), (d_model, dim_feedforward)),
            "b1": nrm(next(keys), (1, dim_feedforward)),
            "W2": nrm(next(keys), (dim_feedforward, d_model)),
            "b2": nrm(next(keys), (1, d_model)),
            "g2": jnp.ones((1, d_model), jnp.float32),
            "be2": jnp.zeros((1, d_model), jnp.float32),
        }
        params["layers"].append(lp)
    return params


@functools.partial(jax.jit, static_argnames=("p", "nhead"))
def transformer_forward(x, params, pe, *, p, nhead):
    """Equivalent of Transformer.forward(x, p) (inference / eval semantics)."""
    # TODO(synk): dropout omitted (eval-mode / inference semantics; dropout is stochastic).
    B, S, _ = x.shape
    T = S + p

    # input projection + zero future padding + positional encoding (fused kernel)
    h = embed(x, params["Wi"], params["bi"], pe[:T])

    # TransformerEncoder: one fused Pallas kernel per layer
    for lp in params["layers"]:
        h = encoder_layer(h, lp, nhead=nhead)

    # output projection on the last p positions.
    # Kept in plain JAX under jit: its stored last dim is input_dim=4 lanes, which
    # would be a masked partial store in a Pallas kernel; XLA fuses it here.
    tail = h[:, S:, :]                                           # (B, p, d_model)
    preds = jnp.einsum("bpd,dn->bpn", tail, params["Wout"]) + params["bout"]
    return preds


# ----------------------------------------------------------------------------
# Main
# ----------------------------------------------------------------------------
if __name__ == "__main__":
    # small config consistent with the module
    input_dim = 4
    d_model = 32
    nhead = 4
    num_layers = 2
    dim_feedforward = 64
    max_len = 500

    B, S, p = 2, 8, 4

    key = jax.random.PRNGKey(0)
    k_x, k_p = jax.random.split(key)
    x = jax.random.normal(k_x, (B, S, input_dim), dtype=jnp.float32)

    params = init_params(k_p, input_dim, d_model, nhead, num_layers, dim_feedforward)
    pe = make_positional_encoding(max_len, d_model)

    preds = transformer_forward(x, params, pe, p=p, nhead=nhead)
    preds = jax.block_until_ready(preds)

    assert preds.shape == (B, p, input_dim)
    assert bool(jnp.all(jnp.isfinite(preds)))
    print("KERNEL_OK")
</pallas_src>

<mosaic_0001>
module attributes {stable_mosaic.version = 11 : i64} {
  func.func @_embed_kernel(%arg0: i32, %arg1: memref<1x8x4xf32, #tpu.memory_space<vmem>>, %arg2: memref<4x32xf32, #tpu.memory_space<vmem>>, %arg3: memref<1x32xf32, #tpu.memory_space<vmem>>, %arg4: memref<12x32xf32, #tpu.memory_space<vmem>>, %arg5: memref<1x12x32xf32, #tpu.memory_space<vmem>>) attributes {dimension_semantics = [#tpu.dimension_semantics<parallel>], iteration_bounds = array<i64: 2>, scalar_prefetch = 0 : i64, scratch_operands = 0 : i64, tpu.core_type = #tpu.core_type<tc>, window_params = [{transform_indices = @transform_0, window_bounds = array<i64: 1, 8, 4>}, {pipeline_mode = #tpu.pipeline_mode<synchronous>, transform_indices = @transform_1, window_bounds = array<i64: 4, 32>}, {pipeline_mode = #tpu.pipeline_mode<synchronous>, transform_indices = @transform_2, window_bounds = array<i64: 1, 32>}, {pipeline_mode = #tpu.pipeline_mode<synchronous>, transform_indices = @transform_3, window_bounds = array<i64: 12, 32>}, {transform_indices = @transform_4, window_bounds = array<i64: 1, 12, 32>}]} {
    %c0 = arith.constant 0 : index
    %c0_0 = arith.constant 0 : index
    %c0_1 = arith.constant 0 : index
    %0 = vector.load %arg1[%c0, %c0_0, %c0_1] : memref<1x8x4xf32, #tpu.memory_space<vmem>>, vector<1x8x4xf32>
    %1 = vector.shape_cast %0 : vector<1x8x4xf32> to vector<8x4xf32>
    %c0_2 = arith.constant 0 : index
    %c0_3 = arith.constant 0 : index
    %2 = vector.load %arg2[%c0_2, %c0_3] : memref<4x32xf32, #tpu.memory_space<vmem>>, vector<4x32xf32>
    %cst = arith.constant dense<0.000000e+00> : vector<8x32xf32>
    %3 = tpu.matmul %1, %2, %cst {dimension_numbers = #tpu.dot_dimension_numbers<[1], [0], [0], [1], [0, 0, 1, 1], [], []>} : vector<8x4xf32>, vector<4x32xf32>, vector<8x32xf32> -> vector<8x32xf32>
    %c0_4 = arith.constant 0 : index
    %c0_5 = arith.constant 0 : index
    %4 = vector.load %arg3[%c0_4, %c0_5] : memref<1x32xf32, #tpu.memory_space<vmem>>, vector<1x32xf32>
    %5 = vector.broadcast %4 : vector<1x32xf32> to vector<8x32xf32>
    %6 = arith.addf %3, %5 : vector<8x32xf32>
    %cst_6 = arith.constant 0.000000e+00 : f32
    %7 = vector.broadcast %cst_6 : f32 to vector<4x32xf32>
    %8 = tpu.concatenate %6, %7 in 0 : vector<8x32xf32>, vector<4x32xf32> -> vector<12x32xf32>
    %c0_7 = arith.constant 0 : index
    %c0_8 = arith.constant 0 : index
    %9 = vector.load %arg4[%c0_7, %c0_8] : memref<12x32xf32, #tpu.memory_space<vmem>>, vector<12x32xf32>
    %10 = arith.addf %8, %9 : vector<12x32xf32>
    %c0_9 = arith.constant 0 : index
    %c0_10 = arith.constant 0 : index
    %c0_11 = arith.constant 0 : index
    %11 = vector.load %arg5[%c0_9, %c0_10, %c0_11] : memref<1x12x32xf32, #tpu.memory_space<vmem>>, vector<1x12x32xf32>
    %12 = vector.shape_cast %11 : vector<1x12x32xf32> to vector<12x32xf32>
    %13 = vector.shape_cast %10 : vector<12x32xf32> to vector<1x12x32xf32>
    tpu.vector_store %arg5[%c0_9, %c0_10, %c0_11], %13 {strides = array<i32>} : memref<1x12x32xf32, #tpu.memory_space<vmem>>, vector<1x12x32xf32>,
    return
  }
  func.func @transform_0(%arg0: i32) -> (i32, i32, i32) {
    %c0_i32 = arith.constant 0 : i32
    %c0_i32_0 = arith.constant 0 : i32
    %c0_i32_1 = arith.constant 0 : i32
    return %arg0, %c0_i32, %c0_i32_0 : i32, i32, i32
  }
  func.func @transform_1(%arg0: i32) -> (i32, i32) {
    %c0_i32 = arith.constant 0 : i32
    %c0_i32_0 = arith.constant 0 : i32
    %c0_i32_1 = arith.constant 0 : i32
    return %c0_i32, %c0_i32_0 : i32, i32
  }
  func.func @transform_2(%arg0: i32) -> (i32, i32) {
    %c0_i32 = arith.constant 0 : i32
    %c0_i32_0 = arith.constant 0 : i32
    %c0_i32_1 = arith.constant 0 : i32
    return %c0_i32, %c0_i32_0 : i32, i32
  }
  func.func @transform_3(%arg0: i32) -> (i32, i32) {
    %c0_i32 = arith.constant 0 : i32
    %c0_i32_0 = arith.constant 0 : i32
    %c0_i32_1 = arith.constant 0 : i32
    return %c0_i32, %c0_i32_0 : i32, i32
  }
  func.func @transform_4(%arg0: i32) -> (i32, i32, i32) {
    %c0_i32 = arith.constant 0 : i32
    %c0_i32_0 = arith.constant 0 : i32
    %c0_i32_1 = arith.constant 0 : i32
    return %arg0, %c0_i32, %c0_i32_0 : i32, i32, i32
  }
}

module attributes {stable_mosaic.version = 11 : i64} {
  func.func @_encoder_layer_kernel(%arg0: i32, %arg1: memref<1x12x32xf32, #tpu.memory_space<vmem>>, %arg2: memref<96x32xf32, #tpu.memory_space<vmem>>, %arg3: memref<96x1xf32, #tpu.memory_space<vmem>>, %arg4: memref<32x32xf32, #tpu.memory_space<vmem>>, %arg5: memref<1x32xf32, #tpu.memory_space<vmem>>, %arg6: memref<1x32xf32, #tpu.memory_space<vmem>>, %arg7: memref<1x32xf32, #tpu.memory_space<vmem>>, %arg8: memref<32x64xf32, #tpu.memory_space<vmem>>, %arg9: memref<1x64xf32, #tpu.memory_space<vmem>>, %arg10: memref<64x32xf32, #tpu.memory_space<vmem>>, %arg11: memref<1x32xf32, #tpu.memory_space<vmem>>, %arg12: memref<1x32xf32, #tpu.memory_space<vmem>>, %arg13: memref<1x32xf32, #tpu.memory_space<vmem>>, %arg14: memref<1x12x32xf32, #tpu.memory_space<vmem>>) attributes {dimension_semantics = [#tpu.dimension_semantics<parallel>], iteration_bounds = array<i64: 2>, scalar_prefetch = 0 : i64, scratch_operands = 0 : i64, tpu.core_type = #tpu.core_type<tc>, window_params = [{transform_indices = @transform_0, window_bounds = array<i64: 1, 12, 32>}, {pipeline_mode = #tpu.pipeline_mode<synchronous>, transform_indices = @transform_1, window_bounds = array<i64: 96, 32>}, {pipeline_mode = #tpu.pipeline_mode<synchronous>, transform_indices = @transform_2, window_bounds = array<i64: 96, 1>}, {pipeline_mode = #tpu.pipeline_mode<synchronous>, transform_indices = @transform_3, window_bounds = array<i64: 32, 32>}, {pipeline_mode = #tpu.pipeline_mode<synchronous>, transform_indices = @transform_4, window_bounds = array<i64: 1, 32>}, {pipeline_mode = #tpu.pipeline_mode<synchronous>, transform_indices = @transform_5, window_bounds = array<i64: 1, 32>}, {pipeline_mode = #tpu.pipeline_mode<synchronous>, transform_indices = @transform_6, window_bounds = array<i64: 1, 32>}, {pipeline_mode = #tpu.pipeline_mode<synchronous>, transform_indices = @transform_7, window_bounds = array<i64: 32, 64>}, {pipeline_mode = #tpu.pipeline_mode<synchronous>, transform_indices = @transform_8, window_bounds = array<i64: 1, 64>}, {pipeline_mode = #tpu.pipeline_mode<synchronous>, transform_indices = @transform_9, window_bounds = array<i64: 64, 32>}, {pipeline_mode = #tpu.pipeline_mode<synchronous>, transform_indices = @transform_10, window_bounds = array<i64: 1, 32>}, {pipeline_mode = #tpu.pipeline_mode<synchronous>, transform_indices = @transform_11, window_bounds = array<i64: 1, 32>}, {pipeline_mode = #tpu.pipeline_mode<synchronous>, transform_indices = @transform_12, window_bounds = array<i64: 1, 32>}, {transform_indices = @transform_13, window_bounds = array<i64: 1, 12, 32>}]} {
    %c0 = arith.constant 0 : index
    %c0_0 = arith.constant 0 : index
    %c0_1 = arith.constant 0 : index
    %0 = vector.load %arg1[%c0, %c0_0, %c0_1] : memref<1x12x32xf32, #tpu.memory_space<vmem>>, vector<1x12x32xf32>
    %1 = vector.shape_cast %0 : vector<1x12x32xf32> to vector<12x32xf32>
    %c0_2 = arith.constant 0 : index
    %c0_3 = arith.constant 0 : index
    %2 = vector.load %arg2[%c0_2, %c0_3] : memref<96x32xf32, #tpu.memory_space<vmem>>, vector<96x32xf32>
    %cst = arith.constant dense<0.000000e+00> : vector<96x12xf32>
    %3 = tpu.matmul %2, %1, %cst {dimension_numbers = #tpu.dot_dimension_numbers<[1], [1], [0], [0], [0, 0, 1, 0], [], []>} : vector<96x32xf32>, vector<12x32xf32>, vector<96x12xf32> -> vector<96x12xf32>
    %c0_4 = arith.constant 0 : index
    %c0_5 = arith.constant 0 : index
    %4 = vector.load %arg3[%c0_4, %c0_5] : memref<96x1xf32, #tpu.memory_space<vmem>>, vector<96x1xf32>
    %5 = vector.broadcast %4 : vector<96x1xf32> to vector<96x12xf32>
    %6 = arith.addf %3, %5 : vector<96x12xf32>
    %7 = tpu.iota {dimensions = array<i32: 0>} : vector<12x12xi32>
    %8 = tpu.iota {dimensions = array<i32: 1>} : vector<12x12xi32>
    %9 = arith.cmpi sgt, %8, %7 : vector<12x12xi32>
    %c0_6 = arith.constant 0 : index
    %c0_7 = arith.constant 0 : index
    %10 = vector.load %arg5[%c0_6, %c0_7] : memref<1x32xf32, #tpu.memory_space<vmem>>, vector<1x32xf32>
    %11 = vector.extract_strided_slice %6 {offsets = [0, 0], sizes = [8, 12], strides = [1, 1]} : vector<96x12xf32> to vector<8x12xf32>
    %12 = vector.extract_strided_slice %6 {offsets = [32, 0], sizes = [8, 12], strides = [1, 1]} : vector<96x12xf32> to vector<8x12xf32>
    %13 = vector.extract_strided_slice %6 {offsets = [64, 0], sizes = [8, 12], strides = [1, 1]} : vector<96x12xf32> to vector<8x12xf32>
    %cst_8 = arith.constant dense<0.000000e+00> : vector<12x12xf32>
    %14 = tpu.matmul %11, %12, %cst_8 {dimension_numbers = #tpu.dot_dimension_numbers<[0], [0], [1], [1], [0, 1, 1, 1], [], []>} : vector<8x12xf32>, vector<8x12xf32>, vector<12x12xf32> -> vector<12x12xf32>
    %cst_9 = arith.constant 0.353553385 : f32
    %15 = vector.broadcast %cst_9 : f32 to vector<12x12xf32>
    %16 = arith.mulf %14, %15 : vector<12x12xf32>
    %cst_10 = arith.constant -1.000000e+30 : f32
    %17 = vector.broadcast %cst_10 : f32 to vector<12x12xf32>
    %18 = arith.select %9, %17, %16 : vector<12x12xi1>, vector<12x12xf32>
    %cst_11 = arith.constant dense<0xFF800000> : vector<12xf32>
    %19 = vector.multi_reduction <maximumf>, %18, %cst_11 [1] : vector<12x12xf32> to vector<12xf32>
    %20 = vector.shape_cast %19 : vector<12xf32> to vector<12x1xf32>
    %21 = vector.broadcast %20 : vector<12x1xf32> to vector<12x12xf32>
    %22 = arith.subf %18, %21 : vector<12x12xf32>
    %23 = math.exp %22 : vector<12x12xf32>
    %cst_12 = arith.constant dense<0.000000e+00> : vector<12xf32>
    %24 = vector.multi_reduction <add>, %23, %cst_12 [1] : vector<12x12xf32> to vector<12xf32>
    %25 = vector.shape_cast %24 : vector<12xf32> to vector<12x1xf32>
    %26 = tpu.reciprocal %25 {approx = true} : vector<12x1xf32> -> vector<12x1xf32>
    %27 = vector.broadcast %26 : vector<12x1xf32> to vector<12x12xf32>
    %28 = arith.mulf %23, %27 : vector<12x12xf32>
    %cst_13 = arith.constant dense<0.000000e+00> : vector<12x8xf32>
    %29 = tpu.matmul %28, %13, %cst_13 {dimension_numbers = #tpu.dot_dimension_numbers<[1], [1], [0], [0], [0, 0, 1, 0], [], []>} : vector<12x12xf32>, vector<8x12xf32>, vector<12x8xf32> -> vector<12x8xf32>
    %c0_14 = arith.constant 0 : index
    %c0_15 = arith.constant 0 : index
    %30 = vector.load %arg4[%c0_14, %c0_15] : memref<32x32xf32, #tpu.memory_space<vmem>>, vector<8x32xf32>
    %cst_16 = arith.constant dense<0.000000e+00> : vector<12x32xf32>
    %31 = tpu.matmul %29, %30, %cst_16 {dimension_numbers = #tpu.dot_dimension_numbers<[1], [0], [0], [1], [0, 0, 1, 1], [], []>} : vector<12x8xf32>, vector<8x32xf32>, vector<12x32xf32> -> vector<12x32xf32>
    %32 = vector.broadcast %10 : vector<1x32xf32> to vector<12x32xf32>
    %33 = arith.addf %32, %31 : vector<12x32xf32>
    %34 = vector.extract_strided_slice %6 {offsets = [8, 0], sizes = [8, 12], strides = [1, 1]} : vector<96x12xf32> to vector<8x12xf32>
    %35 = vector.extract_strided_slice %6 {offsets = [40, 0], sizes = [8, 12], strides = [1, 1]} : vector<96x12xf32> to vector<8x12xf32>
    %36 = vector.extract_strided_slice %6 {offsets = [72, 0], sizes = [8, 12], strides = [1, 1]} : vector<96x12xf32> to vector<8x12xf32>
    %cst_17 = arith.constant dense<0.000000e+00> : vector<12x12xf32>
    %37 = tpu.matmul %34, %35, %cst_17 {dimension_numbers = #tpu.dot_dimension_numbers<[0], [0], [1], [1], [0, 1, 1, 1], [], []>} : vector<8x12xf32>, vector<8x12xf32>, vector<12x12xf32> -> vector<12x12xf32>
    %cst_18 = arith.constant 0.353553385 : f32
    %38 = vector.broadcast %cst_18 : f32 to vector<12x12xf32>
    %39 = arith.mulf %37, %38 : vector<12x12xf32>
    %cst_19 = arith.constant -1.000000e+30 : f32
    %40 = vector.broadcast %cst_19 : f32 to vector<12x12xf32>
    %41 = arith.select %9, %40, %39 : vector<12x12xi1>, vector<12x12xf32>
    %cst_20 = arith.constant dense<0xFF800000> : vector<12xf32>
    %42 = vector.multi_reduction <maximumf>, %41, %cst_20 [1] : vector<12x12xf32> to vector<12xf32>
    %43 = vector.shape_cast %42 : vector<12xf32> to vector<12x1xf32>
    %44 = vector.broadcast %43 : vector<12x1xf32> to vector<12x12xf32>
    %45 = arith.subf %41, %44 : vector<12x12xf32>
    %46 = math.exp %45 : vector<12x12xf32>
    %cst_21 = arith.constant dense<0.000000e+00> : vector<12xf32>
    %47 = vector.multi_reduction <add>, %46, %cst_21 [1] : vector<12x12xf32> to vector<12xf32>
    %48 = vector.shape_cast %47 : vector<12xf32> to vector<12x1xf32>
    %49 = tpu.reciprocal %48 {approx = true} : vector<12x1xf32> -> vector<12x1xf32>
    %50 = vector.broadcast %49 : vector<12x1xf32> to vector<12x12xf32>
    %51 = arith.mulf %46, %50 : vector<12x12xf32>
    %cst_22 = arith.constant dense<0.000000e+00> : vector<12x8xf32>
    %52 = tpu.matmul %51, %36, %cst_22 {dimension_numbers = #tpu.dot_dimension_numbers<[1], [1], [0], [0], [0, 0, 1, 0], [], []>} : vector<12x12xf32>, vector<8x12xf32>, vector<12x8xf32> -> vector<12x8xf32>
    %c8 = arith.constant 8 : index
    %c0_23 = arith.constant 0 : index
    %53 = vector.load %arg4[%c8, %c0_23] : memref<32x32xf32, #tpu.memory_space<vmem>>, vector<8x32xf32>
    %cst_24 = arith.constant dense<0.000000e+00> : vector<12x32xf32>
    %54 = tpu.matmul %52, %53, %cst_24 {dimension_numbers = #tpu.dot_dimension_numbers<[1], [0], [0], [1], [0, 0, 1, 1], [], []>} : vector<12x8xf32>, vector<8x32xf32>, vector<12x32xf32> -> vector<12x32xf32>
    %55 = arith.addf %33, %54 : vector<12x32xf32>
    %56 = vector.extract_strided_slice %6 {offsets = [16, 0], sizes = [8, 12], strides = [1, 1]} : vector<96x12xf32> to vector<8x12xf32>
    %57 = vector.extract_strided_slice %6 {offsets = [48, 0], sizes = [8, 12], strides = [1, 1]} : vector<96x12xf32> to vector<8x12xf32>
    %58 = vector.extract_strided_slice %6 {offsets = [80, 0], sizes = [8, 12], strides = [1, 1]} : vector<96x12xf32> to vector<8x12xf32>
    %cst_25 = arith.constant dense<0.000000e+00> : vector<12x12xf32>
    %59 = tpu.matmul %56, %57, %cst_25 {dimension_numbers = #tpu.dot_dimension_numbers<[0], [0], [1], [1], [0, 1, 1, 1], [], []>} : vector<8x12xf32>, vector<8x12xf32>, vector<12x12xf32> -> vector<12x12xf32>
    %cst_26 = arith.constant 0.353553385 : f32
    %60 = vector.broadcast %cst_26 : f32 to vector<12x12xf32>
    %61 = arith.mulf %59, %60 : vector<12x12xf32>
    %cst_27 = arith.constant -1.000000e+30 : f32
    %62 = vector.broadcast %cst_27 : f32 to vector<12x12xf32>
    %63 = arith.select %9, %62, %61 : vector<12x12xi1>, vector<12x12xf32>
    %cst_28 = arith.constant dense<0xFF800000> : vector<12xf32>
    %64 = vector.multi_reduction <maximumf>, %63, %cst_28 [1] : vector<12x12xf32> to vector<12xf32>
    %65 = vector.shape_cast %64 : vector<12xf32> to vector<12x1xf32>
    %66 = vector.broadcast %65 : vector<12x1xf32> to vector<12x12xf32>
    %67 = arith.subf %63, %66 : vector<12x12xf32>
    %68 = math.exp %67 : vector<12x12xf32>
    %cst_29 = arith.constant dense<0.000000e+00> : vector<12xf32>
    %69 = vector.multi_reduction <add>, %68, %cst_29 [1] : vector<12x12xf32> to vector<12xf32>
    %70 = vector.shape_cast %69 : vector<12xf32> to vector<12x1xf32>
    %71 = tpu.reciprocal %70 {approx = true} : vector<12x1xf32> -> vector<12x1xf32>
    %72 = vector.broadcast %71 : vector<12x1xf32> to vector<12x12xf32>
    %73 = arith.mulf %68, %72 : vector<12x12xf32>
    %cst_30 = arith.constant dense<0.000000e+00> : vector<12x8xf32>
    %74 = tpu.matmul %73, %58, %cst_30 {dimension_numbers = #tpu.dot_dimension_numbers<[1], [1], [0], [0], [0, 0, 1, 0], [], []>} : vector<12x12xf32>, vector<8x12xf32>, vector<12x8xf32> -> vector<12x8xf32>
    %c16 = arith.constant 16 : index
    %c0_31 = arith.constant 0 : index
    %75 = vector.load %arg4[%c16, %c0_31] : memref<32x32xf32, #tpu.memory_space<vmem>>, vector<8x32xf32>
    %cst_32 = arith.constant dense<0.000000e+00> : vector<12x32xf32>
    %76 = tpu.matmul %74, %75, %cst_32 {dimension_numbers = #tpu.dot_dimension_numbers<[1], [0], [0], [1], [0, 0, 1, 1], [], []>} : vector<12x8xf32>, vector<8x32xf32>, vector<12x32xf32> -> vector<12x32xf32>
    %77 = arith.addf %55, %76 : vector<12x32xf32>
    %78 = vector.extract_strided_slice %6 {offsets = [24, 0], sizes = [8, 12], strides = [1, 1]} : vector<96x12xf32> to vector<8x12xf32>
    %79 = vector.extract_strided_slice %6 {offsets = [56, 0], sizes = [8, 12], strides = [1, 1]} : vector<96x12xf32> to vector<8x12xf32>
    %80 = vector.extract_strided_slice %6 {offsets = [88, 0], sizes = [8, 12], strides = [1, 1]} : vector<96x12xf32> to vector<8x12xf32>
    %cst_33 = arith.constant dense<0.000000e+00> : vector<12x12xf32>
    %81 = tpu.matmul %78, %79, %cst_33 {dimension_numbers = #tpu.dot_dimension_numbers<[0], [0], [1], [1], [0, 1, 1, 1], [], []>} : vector<8x12xf32>, vector<8x12xf32>, vector<12x12xf32> -> vector<12x12xf32>
    %cst_34 = arith.constant 0.353553385 : f32
    %82 = vector.broadcast %cst_34 : f32 to vector<12x12xf32>
    %83 = arith.mulf %81, %82 : vector<12x12xf32>
    %cst_35 = arith.constant -1.000000e+30 : f32
    %84 = vector.broadcast %cst_35 : f32 to vector<12x12xf32>
    %85 = arith.select %9, %84, %83 : vector<12x12xi1>, vector<12x12xf32>
    %cst_36 = arith.constant dense<0xFF800000> : vector<12xf32>
    %86 = vector.multi_reduction <maximumf>, %85, %cst_36 [1] : vector<12x12xf32> to vector<12xf32>
    %87 = vector.shape_cast %86 : vector<12xf32> to vector<12x1xf32>
    %88 = vector.broadcast %87 : vector<12x1xf32> to vector<12x12xf32>
    %89 = arith.subf %85, %88 : vector<12x12xf32>
    %90 = math.exp %89 : vector<12x12xf32>
    %cst_37 = arith.constant dense<0.000000e+00> : vector<12xf32>
    %91 = vector.multi_reduction <add>, %90, %cst_37 [1] : vector<12x12xf32> to vector<12xf32>
    %92 = vector.shape_cast %91 : vector<12xf32> to vector<12x1xf32>
    %93 = tpu.reciprocal %92 {approx = true} : vector<12x1xf32> -> vector<12x1xf32>
    %94 = vector.broadcast %93 : vector<12x1xf32> to vector<12x12xf32>
    %95 = arith.mulf %90, %94 : vector<12x12xf32>
    %cst_38 = arith.constant dense<0.000000e+00> : vector<12x8xf32>
    %96 = tpu.matmul %95, %80, %cst_38 {dimension_numbers = #tpu.dot_dimension_numbers<[1], [1], [0], [0], [0, 0, 1, 0], [], []>} : vector<12x12xf32>, vector<8x12xf32>, vector<12x8xf32> -> vector<12x8xf32>
    %c24 = arith.constant 24 : index
    %c0_39 = arith.constant 0 : index
    %97 = vector.load %arg4[%c24, %c0_39] : memref<32x32xf32, #tpu.memory_space<vmem>>, vector<8x32xf32>
    %cst_40 = arith.constant dense<0.000000e+00> : vector<12x32xf32>
    %98 = tpu.matmul %96, %97, %cst_40 {dimension_numbers = #tpu.dot_dimension_numbers<[1], [0], [0], [1], [0, 0, 1, 1], [], []>} : vector<12x8xf32>, vector<8x32xf32>, vector<12x32xf32> -> vector<12x32xf32>
    %99 = arith.addf %77, %98 : vector<12x32xf32>
    %100 = arith.addf %1, %99 : vector<12x32xf32>
    %cst_41 = arith.constant dense<0.000000e+00> : vector<12xf32>
    %101 = vector.multi_reduction <add>, %100, %cst_41 [1] : vector<12x32xf32> to vector<12xf32>
    %102 = vector.shape_cast %101 : vector<12xf32> to vector<12x1xf32>
    %cst_42 = arith.constant 3.200000e+01 : f32
    %103 = vector.broadcast %cst_42 : f32 to vector<12x1xf32>
    %104 = arith.divf %102, %103 : vector<12x1xf32>
    %105 = vector.broadcast %104 : vector<12x1xf32> to vector<12x32xf32>
    %106 = arith.subf %100, %105 : vector<12x32xf32>
    %107 = arith.mulf %106, %106 : vector<12x32xf32>
    %cst_43 = arith.constant dense<0.000000e+00> : vector<12xf32>
    %108 = vector.multi_reduction <add>, %107, %cst_43 [1] : vector<12x32xf32> to vector<12xf32>
    %109 = vector.shape_cast %108 : vector<12xf32> to vector<12x1xf32>
    %cst_44 = arith.constant 3.200000e+01 : f32
    %110 = vector.broadcast %cst_44 : f32 to vector<12x1xf32>
    %111 = arith.divf %109, %110 : vector<12x1xf32>
    %112 = vector.broadcast %104 : vector<12x1xf32> to vector<12x32xf32>
    %113 = arith.subf %100, %112 : vector<12x32xf32>
    %cst_45 = arith.constant 9.99999974E-6 : f32
    %114 = vector.broadcast %cst_45 : f32 to vector<12x1xf32>
    %115 = arith.addf %111, %114 : vector<12x1xf32>
    %116 = math.rsqrt %115 : vector<12x1xf32>
    %117 = vector.broadcast %116 : vector<12x1xf32> to vector<12x32xf32>
    %118 = arith.mulf %113, %117 : vector<12x32xf32>
    %c0_46 = arith.constant 0 : index
    %c0_47 = arith.constant 0 : index
    %119 = vector.load %arg6[%c0_46, %c0_47] : memref<1x32xf32, #tpu.memory_space<vmem>>, vector<1x32xf32>
    %120 = vector.broadcast %119 : vector<1x32xf32> to vector<12x32xf32>
    %121 = arith.mulf %118, %120 : vector<12x32xf32>
    %c0_48 = arith.constant 0 : index
    %c0_49 = arith.constant 0 : index
    %122 = vector.load %arg7[%c0_48, %c0_49] : memref<1x32xf32, #tpu.memory_space<vmem>>, vector<1x32xf32>
    %123 = vector.broadcast %122 : vector<1x32xf32> to vector<12x32xf32>
    %124 = arith.addf %121, %123 : vector<12x32xf32>
    %c0_50 = arith.constant 0 : index
    %c0_51 = arith.constant 0 : index
    %125 = vector.load %arg8[%c0_50, %c0_51] : memref<32x64xf32, #tpu.memory_space<vmem>>, vector<32x64xf32>
    %cst_52 = arith.constant dense<0.000000e+00> : vector<12x64xf32>
    %126 = tpu.matmul %124, %125, %cst_52 {dimension_numbers = #tpu.dot_dimension_numbers<[1], [0], [0], [1], [0, 0, 1, 1], [], []>} : vector<12x32xf32>, vector<32x64xf32>, vector<12x64xf32> -> vector<12x64xf32>
    %c0_53 = arith.constant 0 : index
    %c0_54 = arith.constant 0 : index
    %127 = vector.load %arg9[%c0_53, %c0_54] : memref<1x64xf32, #tpu.memory_space<vmem>>, vector<1x64xf32>
    %128 = vector.broadcast %127 : vector<1x64xf32> to vector<12x64xf32>
    %129 = arith.addf %126, %128 : vector<12x64xf32>
    %cst_55 = arith.constant 0.000000e+00 : f32
    %130 = vector.broadcast %cst_55 : f32 to vector<12x64xf32>
    %131 = arith.maximumf %129, %130 : vector<12x64xf32>
    %c0_56 = arith.constant 0 : index
    %c0_57 = arith.constant 0 : index
    %132 = vector.load %arg10[%c0_56, %c0_57] : memref<64x32xf32, #tpu.memory_space<vmem>>, vector<64x32xf32>
    %cst_58 = arith.constant dense<0.000000e+00> : vector<12x32xf32>
    %133 = tpu.matmul %131, %132, %cst_58 {dimension_numbers = #tpu.dot_dimension_numbers<[1], [0], [0], [1], [0, 0, 1, 1], [], []>} : vector<12x64xf32>, vector<64x32xf32>, vector<12x32xf32> -> vector<12x32xf32>
    %c0_59 = arith.constant 0 : index
    %c0_60 = arith.constant 0 : index
    %134 = vector.load %arg11[%c0_59, %c0_60] : memref<1x32xf32, #tpu.memory_space<vmem>>, vector<1x32xf32>
    %135 = vector.broadcast %134 : vector<1x32xf32> to vector<12x32xf32>
    %136 = arith.addf %133, %135 : vector<12x32xf32>
    %137 = arith.addf %124, %136 : vector<12x32xf32>
    %cst_61 = arith.constant dense<0.000000e+00> : vector<12xf32>
    %138 = vector.multi_reduction <add>, %137, %cst_61 [1] : vector<12x32xf32> to vector<12xf32>
    %139 = vector.shape_cast %138 : vector<12xf32> to vector<12x1xf32>
    %cst_62 = arith.constant 3.200000e+01 : f32
    %140 = vector.broadcast %cst_62 : f32 to vector<12x1xf32>
    %141 = arith.divf %139, %140 : vector<12x1xf32>
    %142 = vector.broadcast %141 : vector<12x1xf32> to vector<12x32xf32>
    %143 = arith.subf %137, %142 : vector<12x32xf32>
    %144 = arith.mulf %143, %143 : vector<12x32xf32>
    %cst_63 = arith.constant dense<0.000000e+00> : vector<12xf32>
    %145 = vector.multi_reduction <add>, %144, %cst_63 [1] : vector<12x32xf32> to vector<12xf32>
    %146 = vector.shape_cast %145 : vector<12xf32> to vector<12x1xf32>
    %cst_64 = arith.constant 3.200000e+01 : f32
    %147 = vector.broadcast %cst_64 : f32 to vector<12x1xf32>
    %148 = arith.divf %146, %147 : vector<12x1xf32>
    %149 = vector.broadcast %141 : vector<12x1xf32> to vector<12x32xf32>
    %150 = arith.subf %137, %149 : vector<12x32xf32>
    %cst_65 = arith.constant 9.99999974E-6 : f32
    %151 = vector.broadcast %cst_65 : f32 to vector<12x1xf32>
    %152 = arith.addf %148, %151 : vector<12x1xf32>
    %153 = math.rsqrt %152 : vector<12x1xf32>
    %154 = vector.broadcast %153 : vector<12x1xf32> to vector<12x32xf32>
    %155 = arith.mulf %150, %154 : vector<12x32xf32>
    %c0_66 = arith.constant 0 : index
    %c0_67 = arith.constant 0 : index
    %156 = vector.load %arg12[%c0_66, %c0_67] : memref<1x32xf32, #tpu.memory_space<vmem>>, vector<1x32xf32>
    %157 = vector.broadcast %156 : vector<1x32xf32> to vector<12x32xf32>
    %158 = arith.mulf %155, %157 : vector<12x32xf32>
    %c0_68 = arith.constant 0 : index
    %c0_69 = arith.constant 0 : index
    %159 = vector.load %arg13[%c0_68, %c0_69] : memref<1x32xf32, #tpu.memory_space<vmem>>, vector<1x32xf32>
    %160 = vector.broadcast %159 : vector<1x32xf32> to vector<12x32xf32>
    %161 = arith.addf %158, %160 : vector<12x32xf32>
    %c0_70 = arith.constant 0 : index
    %c0_71 = arith.constant 0 : index
    %c0_72 = arith.constant 0 : index
    %162 = vector.load %arg14[%c0_70, %c0_71, %c0_72] : memref<1x12x32xf32, #tpu.memory_space<vmem>>, vector<1x12x32xf32>
    %163 = vector.shape_cast %162 : vector<1x12x32xf32> to vector<12x32xf32>
    %164 = vector.shape_cast %161 : vector<12x32xf32> to vector<1x12x32xf32>
    tpu.vector_store %arg14[%c0_70, %c0_71, %c0_72], %164 {strides = array<i32>} : memref<1x12x32xf32, #tpu.memory_space<vmem>>, vector<1x12x32xf32>,
    return
  }
  func.func @transform_0(%arg0: i32) -> (i32, i32, i32) {
    %c0_i32 = arith.constant 0 : i32
    %c0_i32_0 = arith.constant 0 : i32
    %c0_i32_1 = arith.constant 0 : i32
    return %arg0, %c0_i32, %c0_i32_0 : i32, i32, i32
  }
  func.func @transform_1(%arg0: i32) -> (i32, i32) {
    %c0_i32 = arith.constant 0 : i32
    %c0_i32_0 = arith.constant 0 : i32
    %c0_i32_1 = arith.constant 0 : i32
    return %c0_i32, %c0_i32_0 : i32, i32
  }
  func.func @transform_2(%arg0: i32) -> (i32, i32) {
    %c0_i32 = arith.constant 0 : i32
    %c0_i32_0 = arith.constant 0 : i32
    %c0_i32_1 = arith.constant 0 : i32
    return %c0_i32, %c0_i32_0 : i32, i32
  }
  func.func @transform_3(%arg0: i32) -> (i32, i32) {
    %c0_i32 = arith.constant 0 : i32
    %c0_i32_0 = arith.constant 0 : i32
    %c0_i32_1 = arith.constant 0 : i32
    return %c0_i32, %c0_i32_0 : i32, i32
  }
  func.func @transform_4(%arg0: i32) -> (i32, i32) {
    %c0_i32 = arith.constant 0 : i32
    %c0_i32_0 = arith.constant 0 : i32
    %c0_i32_1 = arith.constant 0 : i32
    return %c0_i32, %c0_i32_0 : i32, i32
  }
  func.func @transform_5(%arg0: i32) -> (i32, i32) {
    %c0_i32 = arith.constant 0 : i32
    %c0_i32_0 = arith.constant 0 : i32
    %c0_i32_1 = arith.constant 0 : i32
    return %c0_i32, %c0_i32_0 : i32, i32
  }
  func.func @transform_6(%arg0: i32) -> (i32, i32) {
    %c0_i32 = arith.constant 0 : i32
    %c0_i32_0 = arith.constant 0 : i32
    %c0_i32_1 = arith.constant 0 : i32
    return %c0_i32, %c0_i32_0 : i32, i32
  }
  func.func @transform_7(%arg0: i32) -> (i32, i32) {
    %c0_i32 = arith.constant 0 : i32
    %c0_i32_0 = arith.constant 0 : i32
    %c0_i32_1 = arith.constant 0 : i32
    return %c0_i32, %c0_i32_0 : i32, i32
  }
  func.func @transform_8(%arg0: i32) -> (i32, i32) {
    %c0_i32 = arith.constant 0 : i32
    %c0_i32_0 = arith.constant 0 : i32
    %c0_i32_1 = arith.constant 0 : i32
    return %c0_i32, %c0_i32_0 : i32, i32
  }
  func.func @transform_9(%arg0: i32) -> (i32, i32) {
    %c0_i32 = arith.constant 0 : i32
    %c0_i32_0 = arith.constant 0 : i32
    %c0_i32_1 = arith.constant 0 : i32
    return %c0_i32, %c0_i32_0 : i32, i32
  }
  func.func @transform_10(%arg0: i32) -> (i32, i32) {
    %c0_i32 = arith.constant 0 : i32
    %c0_i32_0 = arith.constant 0 : i32
    %c0_i32_1 = arith.constant 0 : i32
    return %c0_i32, %c0_i32_0 : i32, i32
  }
  func.func @transform_11(%arg0: i32) -> (i32, i32) {
    %c0_i32 = arith.constant 0 : i32
    %c0_i32_0 = arith.constant 0 : i32
    %c0_i32_1 = arith.constant 0 : i32
    return %c0_i32, %c0_i32_0 : i32, i32
  }
  func.func @transform_12(%arg0: i32) -> (i32, i32) {
    %c0_i32 = arith.constant 0 : i32
    %c0_i32_0 = arith.constant 0 : i32
    %c0_i32_1 = arith.constant 0 : i32
    return %c0_i32, %c0_i32_0 : i32, i32
  }
  func.func @transform_13(%arg0: i32) -> (i32, i32, i32) {
    %c0_i32 = arith.constant 0 : i32
    %c0_i32_0 = arith.constant 0 : i32
    %c0_i32_1 = arith.constant 0 : i32
    return %arg0, %c0_i32, %c0_i32_0 : i32, i32, i32
  }
}

</mosaic_0001>

<bundles_post_ra>
// kernel: transformer_forward.3
= control target key start
LH: loop header
LB: loop body
LE: loop exit
PB: predicated region body
PF: predicated region fallthrough
CT: control target
= control target key end

     0   :  { %s411_s15 = smov 0   ;;  %s440_s0 = inlined_call_operand.vmem [shape: f32[2,8,4], index: 0, kind: input, shape index: {}]   ;;  %s441_s1 = inlined_call_operand.vmem [shape: f32[4,32], index: 1, kind: input, shape index: {}]   ;;  %s442_s2 = inlined_call_operand.vmem [shape: f32[1,32], index: 2, kind: input, shape index: {}]   ;;  %s443_s3 = inlined_call_operand.vmem [shape: f32[12,32], index: 3, kind: input, shape index: {}]   ;;  %s444_s4 = inlined_call_operand.vmem [shape: f32[2,12,32], index: 4, kind: output, shape index: {}]  }
   0x1 LB: > { %s345_s16 = sadd.s32 4294967295, %s382_s15   ;;  %p349_p0 = scmp.ge.s32.totalorder %s382_s15, 1  ;;  %s382_s15 = sphi %s411_s15, %s14_s15  }
   0x2   : > { %p161_p1 = scmp.lt.s32.totalorder %s382_s15, 3 }
   0x4   : > { %p162_p2 = pnand %p349_p0, %p161_p1 }
   0x5   : > { %p186_p3 = scmp.lt.s32.totalorder (!%p162_p2), %s345_s16, 1 }
   0x6   : > { %165 = sbr.rel (%p162_p2) target bundleno = 213 (0xd5), region = 36 }
   0xb   : > { %v196_v0 = vld [vmem:[%s441_s1] sm:$0xf]  ;;  %vm208_vm0 = vcmask 1043456   ;;  %v384_v1 = vmov 0.0   ;;  %vm385_vm1 = vmmov 0   ;;  %s446_s16 = smov (!%p186_p3, %s345_s16), 1 }
   0xc   : > { %361 = vmatprep.subr.mxu0 %v384_v1  ;;  %363 = vmatprep.mubr.msk.f32.mxu0 %vm385_vm1, %v384_v1  ;;  %v283_v2 = vld [vmem:[%s443_s3 + $0x8] sm:$0xf]  ;;  %vm288_vm2 = vcmask 257024   ;;  %s350_s21 = sshll.u32 %s446_s16, 3  ;;  %s358_s22 = sshll.u32 %s446_s16, 4  ;;  %vm204_vm3 = vcmask 31744  }
   0xd   : > { %362 = vmatpush3.msk.msra.mxu0 %vm208_vm0, %v196_v0  ;;  %s189_s25 = scalar_lea.vmem %s440_s0, %s350_s21  ;;  %s194_s28 = scalar_lea.vmem %s444_s4, %s358_s22  ;;  %v353_v4 = vld [vmem:[%s442_s2] ss:$0 sm:$0xff]  ;;  %vm286_vm4 = vcmask 261120  }
   0xe   : > { %v195_v3 = vld [vmem:[%s189_s25] sm:$0xff]  ;;  %289 = vst.msk [vmem:[%s194_s28 + $0x8] sm:$0xf] %vm288_vm2, %v283_v2 }
   0xf   : > { %364 = vmatmul.mubr.msk.f32.vlgmr.msra.gmra.mxu0 %vm204_vm3, %v195_v3  ;;  %v282_v6 = vld [vmem:[%s443_s3] sm:$0xff] }
  0xcf   : > { %v278_v5 = vpop.f32.mrf.mxu0 }
  0xd0   : > { %v279_v7 = vadd.f32 %v353_v4, %v278_v5 }
  0xd1   : > { %v365_v8 = vpop.f32.mrf.mxu0 }
  0xd2   : > { %v284_v9 = vadd.f32 %v282_v6, %v279_v7 }
  0xd4   : > { %287 = vst.msk [vmem:[%s194_s28] sm:$0xff] %vm286_vm4, %v284_v9 }
  0xd5 PF: > { %s14_s15 = sadd.s32 1, %s382_s15  }
  0xd6   : > { %p11_p4 = scmp.ge.s32.totalorder %s14_s15, 4  }
  0xd8   :  { %13 = sbr.rel (!%p11_p4) target bundleno = 1 (0x1), region = 66 }

// kernel: transformer_forward.4
= control target key start
LH: loop header
LB: loop body
LE: loop exit
PB: predicated region body
PF: predicated region fallthrough
CT: control target
= control target key end

     0   :  { %s2657_s25 = smov 0   ;;  %s2967_s0 = inlined_call_operand.vmem [shape: f32[2,12,32], index: 0, kind: input, shape index: {}]   ;;  %s2968_s1 = inlined_call_operand.vmem [shape: f32[96,32], index: 1, kind: input, shape index: {}]   ;;  %s2969_s2 = inlined_call_operand.vmem [shape: f32[96,1], index: 2, kind: input, shape index: {}]   ;;  %s2970_s3 = inlined_call_operand.vmem [shape: f32[32,32], index: 3, kind: input, shape index: {}]   ;;  %s2971_s4 = inlined_call_operand.vmem [shape: f32[1,32], index: 4, kind: input, shape index: {}]   ;;  %s2972_s5 = inlined_call_operand.vmem [shape: f32[1,32], index: 5, kind: input, shape index: {}]   ;;  %s2973_s6 = inlined_call_operand.vmem [shape: f32[1,32], index: 6, kind: input, shape index: {}]   ;;  %s2974_s7 = inlined_call_operand.vmem [shape: f32[32,64], index: 7, kind: input, shape index: {}]   ;;  %s2975_s8 = inlined_call_operand.vmem [shape: f32[1,64], index: 8, kind: input, shape index: {}]   ;;  %s2976_s9 = inlined_call_operand.vmem [shape: f32[64,32], index: 9, kind: input, shape index: {}]   ;;  %s2977_s10 = inlined_call_operand.vmem [shape: f32[1,32], index: 10, kind: input, shape index: {}]   ;;  %s2978_s11 = inlined_call_operand.vmem [shape: f32[1,32], index: 11, kind: input, shape index: {}]   ;;  %s2979_s12 = inlined_call_operand.vmem [shape: f32[1,32], index: 12, kind: input, shape index: {}]   ;;  %s2980_s13 = inlined_call_operand.vmem [shape: f32[2,12,32], index: 13, kind: output, shape index: {}]  }
   0x1 LB: > { %s2282_s26 = sadd.s32 4294967295, %s2584_s25   ;;  %p2286_p0 = scmp.ge.s32.totalorder %s2584_s25, 1  ;;  %s2584_s25 = sphi %s2657_s25, %s23_s25  }
   0x2   : > { %p387_p1 = scmp.lt.s32.totalorder %s2584_s25, 3 }
   0x4   : > { %p388_p2 = pnand %p2286_p0, %p387_p1 }
   0x5   : > { %p431_p3 = scmp.lt.s32.totalorder (!%p388_p2), %s2282_s26, 1 }
   0x6   : > { %391 = sbr.rel (%p388_p2) target bundleno = 4243 (0x1093), region = 72 }
   0xb   : > { %vm527_vm0 = vcmask 261120   ;;  %v443_v0 = vld [vmem:[%s2968_s1] sm:$0xff]  ;;  %v2586_v1 = vmov 0   ;;  %s2982_s26 = smov (!%p431_p3, %s2282_s26), 1  ;;  %v444_v6 = vld [vmem:[%s2968_s1 + $0x8] sm:$0xff]  ;;  %v445_v7 = vld [vmem:[%s2968_s1 + $0x10] sm:$0xff]  ;;  %v695_v27 = vlaneseq }
   0xc   : > { %2418 = vmatprep.mubr.msk.f32.mxu0 %vm527_vm0, %v443_v0  ;;  %2536 = vset.pattern.permute.xlu0 %v2586_v1  ;;  %v455_v2 = vld [vmem:[%s2969_s2] sm:$0xff]  ;;  %s2346_s14 = sshll.u32 %s2982_s26, 4  ;;  %v446_v8 = vld [vmem:[%s2968_s1 + $0x18] sm:$0xff]  ;;  %v448_v10 = vld [vmem:[%s2968_s1 + $0x28] sm:$0xff]  ;;  %vm735_vm1 = vcmask 64512   ;;  %vm825_vm3 = vcmask 93184  }
   0xd   : > { %469 = vperm.xlu0 %2536, %v455_v2   ;;  %v459_v3 = vld [vmem:[%s2969_s2 + $0x20] sm:$0xff]  ;;  %s435_s19 = scalar_lea.vmem %s2967_s0, %s2346_s14  ;;  %v449_v23 = vld [vmem:[%s2968_s1 + $0x30] sm:$0xff]  ;;  %v450_v24 = vld [vmem:[%s2968_s1 + $0x38] sm:$0xff]  ;;  %v2737_v28 = vshrl.u32 %v695_v27, 7  ;;  %v2742_v30 = vand.u32 127, %v695_v27  ;;  %vm821_vm5 = vcmask 97280   ;;  %s440_s28 = scalar_lea.vmem %s2980_s13, %s2346_s14 }
   0xe   : > { %v2683_v4 = vld [vmem:[%s435_s19 + $0x8] sm:$0xf]  ;;  %v2685_v5 = vld [vmem:[%s435_s19] sm:$0xff]  ;;  %v453_v58 = vld [vmem:[%s2968_s1 + $0x50] sm:$0xff]  ;;  %vm1945_vm6 = vcmask 257024   ;;  %vm2097_vm7 = vcmask 523264  }
   0xf   : > { %2414 = vmatprep.subr.msk.mxu0 %vm527_vm0, %v2683_v4  ;;  %v447_v9 = vld [vmem:[%s2968_s1 + $0x20] sm:$0xff]  ;;  %v452_v26 = vld [vmem:[%s2968_s1 + $0x48] sm:$0xff]  ;;  %v2740_v29 = vadd.s32 8, %v2737_v28  ;;  %vm700_vm4 = vcmp.gt.s32.totalorder %v2742_v30, %v2737_v28  ;;  %v454_v59 = vld [vmem:[%s2968_s1 + $0x58] sm:$0xff] }
  0x10   : > { %2415 = vmatpush3.xpose.msk.msra.mxu0 %vm527_vm0, %v2683_v4  ;;  %v451_v25 = vld [vmem:[%s2968_s1 + $0x40] sm:$0xff]  ;;  %v456_v39 = vld [vmem:[%s2969_s2 + $0x8] sm:$0xff] }
  0x11   : > { %489 = vperm.xlu0 %2536, %v459_v3   ;;  %2416 = vmatprep.subr.msk.mxu0 %vm527_vm0, %v2685_v5  ;;  %vm701_vm2 = vcmp.gt.s32.totalorder %v2742_v30, %v2740_v29  ;;  %v929_v40 = vld [vmem:[%s2970_s3] sm:$0xff]  ;;  %v460_v41 = vld [vmem:[%s2969_s2 + $0x28] sm:$0xff] }
  0x12   : > { %v464_v56 = vld [vmem:[%s2969_s2 + $0x48] sm:$0xff]  ;;  %v463_v57 = vld [vmem:[%s2969_s2 + $0x40] sm:$0xff] }
  0x14   : > { %2417 = vmatpush3.xpose.msk.msra.mxu0 %vm527_vm0, %v2685_v5 }
  0x17   : > { %2419 = vmatmul.mubr.msk.f32.vlgmr.msra.gmra.mxu0 %vm527_vm0, %v444_v6 }
  0x18   : > { %2421 = vmatprep.mubr.msk.f32.mxu0 %vm527_vm0, %v445_v7 }
  0x1b   : > { %2422 = vmatmul.mubr.msk.f32.gmra.mxu0 %vm527_vm0, %v446_v8 }
  0x1c   : > { %2424 = vmatprep.mubr.msk.f32.mxu0 %vm527_vm0, %v447_v9 }
  0x1f   : > { %2425 = vmatmul.mubr.msk.f32.gmra.mxu0 %vm527_vm0, %v448_v10 }
  0x20   : > { %2427 = vmatprep.mubr.msk.f32.mxu0 %vm527_vm0, %v449_v23 }
  0x23   : > { %2428 = vmatmul.mubr.msk.f32.gmra.mxu0 %vm527_vm0, %v450_v24 }
  0x24   : > { %2430 = vmatprep.mubr.msk.f32.mxu0 %vm527_vm0, %v451_v25 }
  0x27   : > { %2431 = vmatmul.mubr.msk.f32.gmra.mxu0 %vm527_vm0, %v452_v26 }
  0x28   : > { %2433 = vmatprep.mubr.msk.f32.mxu0 %vm527_vm0, %v453_v58 }
  0x2b   : > { %2434 = vmatmul.mubr.msk.f32.gmra.mxu0 %vm527_vm0, %v454_v59  ;;  %v2312_v59 = vld [vmem:[%s2971_s4] ss:$0 sm:$0xff] }
  0x88   : > { %v470_v12 = vpop.permute.xlu0 %469 }
  0x8c   : > { %v490_v18 = vpop.permute.xlu0 %489 }
  0xd7   : > { %v2420_v11 = vpop.f32.mrf.mxu0 }
  0xd9   : > { %v636_v13 = vpop.f32.mrf.mxu0 }
  0xda   : > { %v637_v14 = vadd.f32 %v636_v13, %v470_v12 }
  0xdb   : > { %v2715_v15 = vpop.f32.mrf.mxu0 }
  0xdc   : > { %703 = vxpose.xlu1.b32.start.end [1/1] (short) (narrow) %v637_v14, 16 }
  0xdd   : > { %v2717_v16 = vpop.f32.mrf.mxu0 }
  0xdf   : > { %v2426_v17 = vpop.f32.mrf.mxu0 }
  0xe1   : > { %v656_v19 = vpop.f32.mrf.mxu0 }
  0xe2   : > { %v657_v20 = vadd.f32 %v656_v19, %v490_v18 }
  0xe3   : > { %v2781_v60 = vpop.f32.mrf.mxu0 }
  0xe4   : > { %2436 = vmatprep.subr.mxu1 %v657_v20 }
  0xe5   : > { %2437 = vmatpush3.msra.mxu1 %v657_v20  ;;  %v2783_v62 = vpop.f32.mrf.mxu0 }
  0xe6   : > { %2446 = vmatprep.subr.mxu1 %v929_v40 }
  0xe7   : > { %v2432_v0 = vpop.f32.mrf.mxu0 }
  0xfa   : > { %2537 = vset.pattern.permute.xlu1 %v2586_v1  ;;  %v676_v1 = vpop.f32.mrf.mxu0 }
 0x158   : > { %v719_v21 = vpop.trf.xlu1 }
 0x159   : > { %2438 = vmatprep.mubr.msk.f32.mxu1 %vm735_vm1, %v719_v21 }
 0x15c   : > { %v720_v22 = vpop.trf.xlu1 }
 0x15d   : > { %2439 = vmatmul.mubr.msk.f32.vlgmr.msra.gmra.mxu1 %vm735_vm1, %v720_v22 }
 0x15e   : > { %2447 = vmatpush3.msra.mxu1 %v929_v40 }
 0x21d   : > { %v2440_v31 = vpop.f32.mrf.mxu1 }
 0x21e   : > { %v818_v32 = vmul.f32 0.35355338, %v2440_v31 }
 0x21f   : > { %v808_v33 = vpop.f32.mrf.mxu1 }
 0x220   : > { %v817_v34 = vmul.f32 0.35355338, %v808_v33  ;;  %v820_v35 = vsel %vm701_vm2, -1e+30, %v818_v32 }
 0x221   : > { %v826_v36 = vsel %vm825_vm3, %v820_v35, -inf }
 0x222   : > { %827 = vmax.xlane.f32.xlu0 %v826_v36  ;;  %v819_v37 = vsel %vm700_vm4, -1e+30, %v817_v34 }
 0x223   : > { %v822_v38 = vsel %vm821_vm5, %v819_v37, -inf }
 0x224   : > { %823 = vmax.xlane.f32.xlu1 %v822_v38 }
 0x235   : > { %474 = vperm.xlu1 %2537, %v456_v39  }
 0x239   : > { %494 = vperm.xlu1 %2537, %v460_v41  }
 0x2ab   : > { %v828_v42 = vpop.xlane.xlu0 %827 }
 0x2ac   : > { %v830_v43 = vsub.f32 %v820_v35, %v828_v42 }
 0x2ad   : > { %v824_v44 = vpop.xlane.xlu1 %823 }
 0x2ae   : > { %v833_v45 = vmul.f32 1.442695, %v830_v43  ;;  %v829_v46 = vsub.f32 %v819_v37, %v824_v44  ;;  %v457_v43 = vld [vmem:[%s2969_s2 + $0x10] sm:$0xff]  ;;  %v1242_v44 = vld [vmem:[%s2970_s3 + $0x8] sm:$0xff] }
 0x2b0   : > { %2538 = vpow2.f32 %v833_v45  ;;  %v831_v47 = vmul.f32 1.442695, %v829_v46  ;;  %v461_v45 = vld [vmem:[%s2969_s2 + $0x30] sm:$0xff] }
 0x2b1   : > { %v475_v48 = vpop.permute.xlu1 %474 }
 0x2b2   : > { %2540 = vpow2.f32 %v831_v47  ;;  %v642_v49 = vadd.f32 %v2420_v11, %v475_v48  ;;  %v2789_v11 = vpop.f32.mrf.mxu0 }
 0x2b4   : > { %1019 = vxpose.xlu1.b32.start.end [1/1] (short) (narrow) %v642_v49, 16  ;;  %v2791_v13 = vpop.f32.mrf.mxu0 }
 0x2b5   : > { %v495_v50 = vpop.permute.xlu1 %494 }
 0x2b6   : > { %v662_v51 = vadd.f32 %v2426_v17, %v495_v50 }
 0x2b8   : > { %2451 = vmatprep.subr.mxu1 %v662_v51 }
 0x2bd   : > { %v2539_v52 = vpop.eup %2538 }
 0x2be   : > { %v838_v53 = vsel %vm825_vm3, %v2539_v52, 0.0 }
 0x2bf   : > { %v2541_v54 = vpop.eup %2540  ;;  %839 = vadd.xlane.f32.xlu0 %v838_v53 }
 0x2c0   : > { %v835_v55 = vsel %vm821_vm5, %v2541_v54, 0.0 }
 0x2c3   : > { %836 = vadd.xlane.f32.xlu0 %v835_v55 }
 0x2d6   : > { %514 = vperm.xlu1 %2537, %v464_v56  }
 0x2d9   : > { %509 = vperm.xlu0 %2536, %v463_v57  }
 0x330   : > { %v1035_v10 = vpop.trf.xlu1 }
 0x334   : > { %v1036_v12 = vpop.trf.xlu1 }
 0x348   : > { %v840_v61 = vpop.xlane.xlu0 %839 }
 0x349   : > { %2542 = vrcp.f32 %v840_v61 }
 0x34c   : > { %v837_v63 = vpop.xlane.xlu0 %836 }
 0x34d   : > { %2544 = vrcp.f32 %v837_v63 }
 0x351   : > { %v515_v17 = vpop.permute.xlu1 %514 }
 0x352   : > { %v682_v19 = vadd.f32 %v2432_v0, %v515_v17  ;;  %v458_v17 = vld [vmem:[%s2969_s2 + $0x18] sm:$0xff] }
 0x354   : > { %v510_v2 = vpop.permute.xlu0 %509 }
 0x355   : > { %v677_v3 = vadd.f32 %v676_v1, %v510_v2 }
 0x356   : > { %v2543_v6 = vpop.eup %2542 }
 0x357   : > { %2441 = vmatprep.subr.msk.mxu0 %vm821_vm5, %v677_v3  ;;  %v844_v9 = vmul.f32 %v2543_v6, %v2539_v52 }
 0x358   : > { %2442 = vmatpush3.xpose.msk.msra.mxu0 %vm821_vm5, %v677_v3 }
 0x35a   : > { %v2545_v7 = vpop.eup %2544 }
 0x35b   : > { %v843_v8 = vmul.f32 %v2545_v7, %v2541_v54 }
 0x35d   : > { %2443 = vmatprep.mubr.msk.f32.mxu0 %vm821_vm5, %v843_v8 }
 0x35e   : > { %2444 = vmatmul.mubr.msk.f32.vlgmr.msra.gmra.mxu0 %vm821_vm5, %v844_v9 }
 0x41e   : > { %v2445_v14 = vpop.f32.mrf.mxu0 }
 0x420   : > { %v920_v18 = vpop.f32.mrf.mxu0 }
 0x421   : > { %2448 = vmatprep.mubr.msk.f32.mxu1 %vm735_vm1, %v920_v18 }
 0x422   : > { %2449 = vmatmul.mubr.msk.f32.vlgmr.msra.gmra.mxu1 %vm735_vm1, %v2445_v14 }
 0x423   : > { %2452 = vmatpush3.msra.mxu1 %v662_v51  ;;  %2453 = vmatprep.mubr.msk.f32.mxu1 %vm735_vm1, %v1035_v10 }
 0x424   : > { %2456 = vmatprep.subr.msk.mxu1 %vm821_vm5, %v682_v19 }
 0x426   : > { %2454 = vmatmul.mubr.msk.f32.vlgmr.msra.gmra.mxu1 %vm735_vm1, %v1036_v12 }
 0x427   : > { %2457 = vmatpush3.xpose.msk.msra.mxu1 %vm821_vm5, %v682_v19 }
 0x428   : > { %2461 = vmatprep.subr.mxu1 %v1242_v44 }
 0x4e2   : > { %v2450_v20 = vpop.f32.mrf.mxu1 }
 0x4e3   : > { %v1018_v61 = vadd.f32 %v2450_v20, %v2312_v59 }
 0x4e4   : > { %v1002_v21 = vpop.f32.mrf.mxu1 }
 0x4e5   : > { %v1017_v63 = vadd.f32 %v2312_v59, %v1002_v21 }
 0x4e6   : > { %v2455_v22 = vpop.f32.mrf.mxu1 }
 0x4e7   : > { %v1133_v24 = vmul.f32 0.35355338, %v2455_v22 }
 0x4e8   : > { %v1123_v23 = vpop.f32.mrf.mxu1 }
 0x4e9   : > { %v1132_v25 = vmul.f32 0.35355338, %v1123_v23  ;;  %v1135_v31 = vsel %vm701_vm2, -1e+30, %v1133_v24 }
 0x4ea   : > { %v1139_v32 = vsel %vm825_vm3, %v1135_v31, -inf }
 0x4eb   : > { %v1134_v26 = vsel %vm700_vm4, -1e+30, %v1132_v25 }
 0x4ec   : > { %v1136_v27 = vsel %vm821_vm5, %v1134_v26, -inf }
 0x4ed   : > { %1137 = vmax.xlane.f32.xlu0 %v1136_v27 }
 0x4f1   : > { %1140 = vmax.xlane.f32.xlu0 %v1139_v32  ;;  %v465_v32 = vld [vmem:[%s2969_s2 + $0x50] sm:$0xff] }
 0x576   : > { %v1138_v33 = vpop.xlane.xlu0 %1137 }
 0x577   : > { %v1142_v34 = vsub.f32 %v1134_v26, %v1138_v33 }
 0x579   : > { %v1144_v35 = vmul.f32 1.442695, %v1142_v34 }
 0x57a   : > { %v1141_v36 = vpop.xlane.xlu0 %1140 }
 0x57b   : > { %2546 = vpow2.f32 %v1144_v35  ;;  %v1143_v37 = vsub.f32 %v1135_v31, %v1141_v36  ;;  %v462_v31 = vld [vmem:[%s2969_s2 + $0x38] sm:$0xff] }
 0x57d   : > { %v1146_v38 = vmul.f32 1.442695, %v1143_v37 }
 0x57f   : > { %2548 = vpow2.f32 %v1146_v38 }
 0x588   : > { %v2547_v39 = vpop.eup %2546 }
 0x589   : > { %v1148_v40 = vsel %vm821_vm5, %v2547_v39, 0.0 }
 0x58a   : > { %1149 = vadd.xlane.f32.xlu0 %v1148_v40 }
 0x58c   : > { %v2549_v41 = vpop.eup %2548 }
 0x58d   : > { %v1151_v42 = vsel %vm825_vm3, %v2549_v41, 0.0 }
 0x58e   : > { %1152 = vadd.xlane.f32.xlu0 %v1151_v42 }
 0x5a4   : > { %479 = vperm.xlu0 %2536, %v457_v43  }
 0x5a8   : > { %499 = vperm.xlu0 %2536, %v461_v45  }
 0x613   : > { %v1150_v46 = vpop.xlane.xlu0 %1149 }
 0x614   : > { %2550 = vrcp.f32 %v1150_v46 }
 0x617   : > { %v1153_v47 = vpop.xlane.xlu0 %1152 }
 0x618   : > { %2552 = vrcp.f32 %v1153_v47 }
 0x61f   : > { %v480_v48 = vpop.permute.xlu0 %479 }
 0x620   : > { %v647_v49 = vadd.f32 %v2717_v16, %v480_v48 }
 0x621   : > { %v2551_v50 = vpop.eup %2550 }
 0x622   : > { %1326 = vxpose.xlu0.b32.start.end [1/1] (short) (narrow) %v647_v49, 16  ;;  %v1156_v51 = vmul.f32 %v2551_v50, %v2547_v39 }
 0x623   : > { %v500_v53 = vpop.permute.xlu0 %499 }
 0x624   : > { %2458 = vmatprep.mubr.msk.f32.mxu1 %vm821_vm5, %v1156_v51  ;;  %v667_v55 = vadd.f32 %v2783_v62, %v500_v53 }
 0x625   : > { %v2553_v52 = vpop.eup %2552 }
 0x626   : > { %v1157_v54 = vmul.f32 %v2553_v52, %v2549_v41 }
 0x628   : > { %2459 = vmatmul.mubr.msk.f32.vlgmr.msra.gmra.mxu1 %vm821_vm5, %v1157_v54 }
 0x629   : > { %2462 = vmatpush3.msra.mxu1 %v1242_v44 }
 0x62a   : > { %2466 = vmatprep.subr.mxu1 %v667_v55 }
 0x69e   : > { %v1342_v56 = vpop.trf.xlu0 }
 0x6a2   : > { %v1343_v16 = vpop.trf.xlu0 }
 0x6e8   : > { %v2460_v57 = vpop.f32.mrf.mxu1 }
 0x6ea   : > { %v1233_v58 = vpop.f32.mrf.mxu1 }
 0x6eb   : > { %2463 = vmatprep.mubr.msk.f32.mxu1 %vm735_vm1, %v1233_v58 }
 0x6ec   : > { %2464 = vmatmul.mubr.msk.f32.vlgmr.msra.gmra.mxu1 %vm735_vm1, %v2460_v57 }
 0x6ed   : > { %2467 = vmatpush3.msra.mxu1 %v667_v55  ;;  %2468 = vmatprep.mubr.msk.f32.mxu1 %vm735_vm1, %v1342_v56 }
 0x6f0   : > { %2469 = vmatmul.mubr.msk.f32.vlgmr.msra.gmra.mxu1 %vm735_vm1, %v1343_v16 }
 0x7ac   : > { %v2465_v62 = vpop.f32.mrf.mxu1 }
 0x7ad   : > { %v2829_v0 = vadd.f32 %v2465_v62, %v1018_v61 }
 0x7ae   : > { %v1315_v1 = vpop.f32.mrf.mxu1 }
 0x7af   : > { %v2831_v2 = vadd.f32 %v1315_v1, %v1017_v63  ;;  %v466_v1 = vld [vmem:[%s2969_s2 + $0x58] sm:$0xff] }
 0x7b0   : > { %v2470_v3 = vpop.f32.mrf.mxu1 }
 0x7b1   : > { %v1440_v6 = vmul.f32 0.35355338, %v2470_v3 }
 0x7b2   : > { %v1430_v7 = vpop.f32.mrf.mxu1 }
 0x7b3   : > { %v1439_v8 = vmul.f32 0.35355338, %v1430_v7  ;;  %v1442_v9 = vsel %vm701_vm2, -1e+30, %v1440_v6 }
 0x7b4   : > { %v1446_v10 = vsel %vm825_vm3, %v1442_v9, -inf }
 0x7b5   : > { %1447 = vmax.xlane.f32.xlu0 %v1446_v10  ;;  %v1441_v12 = vsel %vm700_vm4, -1e+30, %v1439_v8 }
 0x7b6   : > { %v1443_v14 = vsel %vm821_vm5, %v1441_v12, -inf }
 0x7b7   : > { %1444 = vmax.xlane.f32.xlu1 %v1443_v14  ;;  %v1856_v14 = vld [vmem:[%s2970_s3 + $0x18] sm:$0xff] }
 0x7c8   : > { %484 = vperm.xlu1 %2537, %v458_v17  }
 0x83e   : > { %v1448_v18 = vpop.xlane.xlu0 %1447 }
 0x83f   : > { %v1450_v19 = vsub.f32 %v1442_v9, %v1448_v18 }
 0x840   : > { %v1445_v20 = vpop.xlane.xlu1 %1444 }
 0x841   : > { %v1453_v21 = vmul.f32 1.442695, %v1450_v19  ;;  %v1449_v22 = vsub.f32 %v1441_v12, %v1445_v20 }
 0x843   : > { %2554 = vpow2.f32 %v1453_v21  ;;  %v1451_v23 = vmul.f32 1.442695, %v1449_v22 }
 0x844   : > { %v485_v33 = vpop.permute.xlu1 %484 }
 0x845   : > { %2556 = vpow2.f32 %v1451_v23  ;;  %v652_v34 = vadd.f32 %v2715_v15, %v485_v33 }
 0x850   : > { %v2555_v24 = vpop.eup %2554 }
 0x851   : > { %v1458_v25 = vsel %vm825_vm3, %v2555_v24, 0.0 }
 0x852   : > { %v2557_v26 = vpop.eup %2556  ;;  %1459 = vadd.xlane.f32.xlu0 %v1458_v25 }
 0x853   : > { %v1455_v27 = vsel %vm821_vm5, %v2557_v26, 0.0 }
 0x854   : > { %1456 = vadd.xlane.f32.xlu1 %v1455_v27 }
 0x865   : > { %504 = vperm.xlu1 %2537, %v462_v31  }
 0x868   : > { %519 = vperm.xlu0 %2536, %v465_v32  }
 0x886   : > { %1633 = vxpose.xlu0.b32.start.end [1/1] (short) (narrow) %v652_v34, 16 }
 0x8db   : > { %v1460_v35 = vpop.xlane.xlu0 %1459 }
 0x8dc   : > { %2558 = vrcp.f32 %v1460_v35 }
 0x8dd   : > { %v1457_v36 = vpop.xlane.xlu1 %1456 }
 0x8de   : > { %2560 = vrcp.f32 %v1457_v36 }
 0x8e1   : > { %v505_v37 = vpop.permute.xlu1 %504 }
 0x8e2   : > { %v672_v40 = vadd.f32 %v2781_v60, %v505_v37  ;;  %v1549_v60 = vld [vmem:[%s2970_s3 + $0x10] sm:$0xff] }
 0x8e3   : > { %v520_v38 = vpop.permute.xlu0 %519  ;;  %2476 = vmatprep.subr.mxu0 %v1549_v60 }
 0x8e4   : > { %v687_v39 = vadd.f32 %v2791_v13, %v520_v38  ;;  %2477 = vmatpush3.msra.mxu0 %v1549_v60 }
 0x8e6   : > { %2471 = vmatprep.subr.msk.mxu1 %vm821_vm5, %v687_v39 }
 0x8e7   : > { %2472 = vmatpush3.xpose.msk.msra.mxu1 %vm821_vm5, %v687_v39  ;;  %v1990_v39 = vld [vmem:[%s2974_s7 + $0x10] sm:$0xff] }
 0x8e8   : > { %2481 = vmatprep.subr.mxu1 %v672_v40 }
 0x8e9   : > { %v2559_v41 = vpop.eup %2558 }
 0x8ea   : > { %v1464_v15 = vmul.f32 %v2559_v41, %v2555_v24  ;;  %v1988_v41 = vld [vmem:[%s2974_s7] sm:$0xff] }
 0x8eb   : > { %v2561_v42 = vpop.eup %2560 }
 0x8ec   : > { %v1463_v43 = vmul.f32 %v2561_v42, %v2557_v26  ;;  %v2089_v42 = vld [vmem:[%s2976_s9 + $0x38] sm:$0xff] }
 0x8ee   : > { %2473 = vmatprep.mubr.msk.f32.mxu1 %vm821_vm5, %v1463_v43  ;;  %v2088_v43 = vld [vmem:[%s2976_s9 + $0x30] sm:$0xff] }
 0x8ef   : > { %2474 = vmatmul.mubr.msk.f32.vlgmr.msra.gmra.mxu1 %vm821_vm5, %v1464_v15  ;;  %v2087_v15 = vld [vmem:[%s2976_s9 + $0x28] sm:$0xff] }
 0x8f0   : > { %2482 = vmatpush3.msra.mxu1 %v672_v40  ;;  %v1989_v40 = vld [vmem:[%s2974_s7 + $0x8] sm:$0xff] }
 0x8f1   : > { %2491 = vmatprep.subr.mxu1 %v1856_v14 }
 0x902   : > { %v1649_v44 = vpop.trf.xlu0 }
 0x903   : > { %2483 = vmatprep.mubr.msk.f32.mxu1 %vm735_vm1, %v1649_v44  ;;  %v2086_v44 = vld [vmem:[%s2976_s9 + $0x20] sm:$0xff] }
 0x906   : > { %v1650_v13 = vpop.trf.xlu0 }
 0x907   : > { %2484 = vmatmul.mubr.msk.f32.vlgmr.msra.gmra.mxu1 %vm735_vm1, %v1650_v13 }
 0x908   : > { %2492 = vmatpush3.msra.mxu1 %v1856_v14 }
 0x909   : > { %2507 = vmatprep.subr.mxu1 %v2089_v42 }
 0x9af   : > { %v2475_v45 = vpop.f32.mrf.mxu1 }
 0x9b1   : > { %v1540_v46 = vpop.f32.mrf.mxu1 }
 0x9b2   : > { %2478 = vmatprep.mubr.msk.f32.mxu0 %vm735_vm1, %v1540_v46 }
 0x9b3   : > { %2479 = vmatmul.mubr.msk.f32.vlgmr.msra.gmra.mxu0 %vm735_vm1, %v2475_v45 }
 0x9c7   : > { %v2485_v47 = vpop.f32.mrf.mxu1 }
 0x9c8   : > { %v1747_v48 = vmul.f32 0.35355338, %v2485_v47 }
 0x9c9   : > { %v1737_v49 = vpop.f32.mrf.mxu1 }
 0x9ca   : > { %v1746_v50 = vmul.f32 0.35355338, %v1737_v49  ;;  %v1749_v51 = vsel %vm701_vm2, -1e+30, %v1747_v48 }
 0x9cb   : > { %v1753_v52 = vsel %vm825_vm3, %v1749_v51, -inf }
 0x9cc   : > { %1754 = vmax.xlane.f32.xlu0 %v1753_v52  ;;  %v1748_v53 = vsel %vm700_vm4, -1e+30, %v1746_v50  ;;  %v2334_v50 = vld [vmem:[%s2972_s5] ss:$0 sm:$0xff] }
 0x9cd   : > { %v1750_v54 = vsel %vm821_vm5, %v1748_v53, -inf  ;;  %v2335_v52 = vld [vmem:[%s2973_s6] ss:$0 sm:$0xff] }
 0x9ce   : > { %1751 = vmax.xlane.f32.xlu1 %v1750_v54 }
 0xa55   : > { %v1755_v55 = vpop.xlane.xlu0 %1754 }
 0xa56   : > { %v1757_v56 = vsub.f32 %v1749_v51, %v1755_v55 }
 0xa57   : > { %v1752_v57 = vpop.xlane.xlu1 %1751 }
 0xa58   : > { %v1760_v58 = vmul.f32 1.442695, %v1757_v56  ;;  %v1756_v16 = vsub.f32 %v1748_v53, %v1752_v57 }
 0xa5a   : > { %2562 = vpow2.f32 %v1760_v58  ;;  %v1758_v59 = vmul.f32 1.442695, %v1756_v16  ;;  %v2085_v16 = vld [vmem:[%s2976_s9 + $0x18] sm:$0xff] }
 0xa5c   : > { %2564 = vpow2.f32 %v1758_v59  ;;  %v2084_v59 = vld [vmem:[%s2976_s9 + $0x10] sm:$0xff] }
 0xa67   : > { %v2563_v29 = vpop.eup %2562 }
 0xa68   : > { %v1765_v61 = vsel %vm825_vm3, %v2563_v29, 0.0 }
 0xa69   : > { %v2565_v62 = vpop.eup %2564  ;;  %1766 = vadd.xlane.f32.xlu1 %v1765_v61  ;;  %v2082_v61 = vld [vmem:[%s2976_s9] sm:$0xff] }
 0xa6a   : > { %v1762_v63 = vsel %vm821_vm5, %v2565_v62, 0.0 }
 0xa6d   : > { %1763 = vadd.xlane.f32.xlu1 %v1762_v63 }
 0xa73   : > { %v2480_v28 = vpop.f32.mrf.mxu0 }
 0xa74   : > { %v1632_v30 = vadd.f32 %v2480_v28, %v2829_v0 }
 0xa75   : > { %v1622_v17 = vpop.f32.mrf.mxu0 }
 0xa76   : > { %v1631_v20 = vadd.f32 %v1622_v17, %v2831_v2 }
 0xa7e   : > { %524 = vperm.xlu1 %2537, %v466_v1  }
 0xaf2   : > { %v1767_v3 = vpop.xlane.xlu1 %1766 }
 0xaf3   : > { %2566 = vrcp.f32 %v1767_v3 }
 0xaf6   : > { %v1764_v6 = vpop.xlane.xlu1 %1763 }
 0xaf7   : > { %2568 = vrcp.f32 %v1764_v6 }
 0xafa   : > { %v525_v7 = vpop.permute.xlu1 %524 }
 0xafb   : > { %v692_v8 = vadd.f32 %v2789_v11, %v525_v7 }
 0xafd   : > { %2486 = vmatprep.subr.msk.mxu0 %vm821_vm5, %v692_v8 }
 0xafe   : > { %2487 = vmatpush3.xpose.msk.msra.mxu0 %vm821_vm5, %v692_v8  ;;  %v2339_v8 = vld [vmem:[%s2977_s10] ss:$0 sm:$0xff] }
 0xb00   : > { %v2567_v9 = vpop.eup %2566 }
 0xb01   : > { %v1771_v0 = vmul.f32 %v2567_v9, %v2563_v29  ;;  %v2083_v29 = vld [vmem:[%s2976_s9 + $0x8] sm:$0xff] }
 0xb04   : > { %v2569_v10 = vpop.eup %2568 }
 0xb05   : > { %v1770_v12 = vmul.f32 %v2569_v10, %v2565_v62  ;;  %v2336_v62 = vld [vmem:[%s2975_s8] ss:$0 sm:$0xff] }
 0xb07   : > { %2488 = vmatprep.mubr.msk.f32.mxu0 %vm821_vm5, %v1770_v12 }
 0xb08   : > { %2489 = vmatmul.mubr.msk.f32.vlgmr.msra.gmra.mxu0 %vm821_vm5, %v1771_v0 }
 0xbc8   : > { %v2490_v11 = vpop.f32.mrf.mxu0 }
 0xbca   : > { %v1847_v18 = vpop.f32.mrf.mxu0 }
 0xbcb   : > { %2493 = vmatprep.mubr.msk.f32.mxu1 %vm735_vm1, %v1847_v18 }
 0xbcc   : > { %2494 = vmatmul.mubr.msk.f32.vlgmr.msra.gmra.mxu1 %vm735_vm1, %v2490_v11 }
 0xbcd   : > { %2508 = vmatpush3.msra.mxu1 %v2089_v42 }
 0xbce   : > { %2509 = vmatprep.subr.mxu1 %v2088_v43 }
 0xbcf   : > { %2510 = vmatpush3.msra.mxu1 %v2088_v43 }
 0xbd0   : > { %2511 = vmatprep.subr.mxu1 %v2087_v15 }
 0xbd1   : > { %2512 = vmatpush3.msra.mxu1 %v2087_v15 }
 0xbd2   : > { %2513 = vmatprep.subr.mxu1 %v2086_v44 }
 0xbd3   : > { %2514 = vmatpush3.msra.mxu1 %v2086_v44 }
 0xbd4   : > { %2515 = vmatprep.subr.mxu1 %v2085_v16 }
 0xbd5   : > { %2516 = vmatpush3.msra.mxu1 %v2085_v16 }
 0xbd6   : > { %2517 = vmatprep.subr.mxu1 %v2084_v59 }
 0xbd7   : > { %2518 = vmatpush3.msra.mxu1 %v2084_v59 }
 0xbd8   : > { %2519 = vmatprep.subr.mxu1 %v2083_v29 }
 0xbd9   : > { %2520 = vmatpush3.msra.mxu1 %v2083_v29 }
 0xbda   : > { %2521 = vmatprep.subr.mxu1 %v2082_v61 }
 0xbdb   : > { %2522 = vmatpush3.msra.mxu1 %v2082_v61 }
 0xc8c   : > { %v2495_v19 = vpop.f32.mrf.mxu1 }
 0xc8d   : > { %v1939_v21 = vadd.f32 %v2495_v19, %v1632_v30 }
 0xc8e   : > { %v1929_v22 = vpop.f32.mrf.mxu1 }
 0xc8f   : > { %v1938_v23 = vadd.f32 %v1929_v22, %v1631_v20  ;;  %v1941_v24 = vadd.f32 %v1939_v21, %v2683_v4 }
 0xc91   : > { %v1946_v25 = vsel %vm1945_vm6, %v1941_v24, 0.0  ;;  %v1940_v26 = vadd.f32 %v1938_v23, %v2685_v5  ;;  %v1991_v5 = vld [vmem:[%s2974_s7 + $0x18] sm:$0xff] }
 0xc92   : > { %1947 = vadd.xlane.f32.xlu0 %v1946_v25  ;;  %2496 = vmatprep.subr.mxu0 %v1991_v5 }
 0xc93   : > { %v1942_v27 = vsel %vm527_vm0, %v1940_v26, 0.0  ;;  %2497 = vmatpush3.msra.mxu0 %v1991_v5 }
 0xc94   : > { %1943 = vadd.xlane.f32.xlu1 %v1942_v27  ;;  %2498 = vmatprep.subr.mxu0 %v1990_v39 }
 0xc95   : > { %2499 = vmatpush3.msra.mxu0 %v1990_v39 }
 0xc96   : > { %2500 = vmatprep.subr.mxu0 %v1989_v40 }
 0xc97   : > { %2501 = vmatpush3.msra.mxu0 %v1989_v40 }
 0xc98   : > { %2502 = vmatprep.subr.mxu0 %v1988_v41 }
 0xc99   : > { %2503 = vmatpush3.msra.mxu0 %v1988_v41 }
 0xd1b   : > { %v1948_v31 = vpop.xlane.xlu0 %1947 }
 0xd1c   : > { %v1951_v32 = vmul.f32 0.03125, %v1948_v31 }
 0xd1d   : > { %v1944_v33 = vpop.xlane.xlu1 %1943 }
 0xd1e   : > { %v1950_v34 = vmul.f32 0.03125, %v1944_v33  ;;  %v1953_v35 = vsub.f32 %v1941_v24, %v1951_v32 }
 0xd20   : > { %v1952_v2 = vsub.f32 %v1940_v26, %v1950_v34  ;;  %v1955_v38 = vmul.f32 %v1953_v35, %v1953_v35 }
 0xd22   : > { %v1954_v36 = vmul.f32 %v1952_v2, %v1952_v2  ;;  %v1959_v4 = vsel %vm1945_vm6, %v1955_v38, 0.0 }
 0xd24   : > { %v1956_v37 = vsel %vm527_vm0, %v1954_v36, 0.0 }
 0xd25   : > { %1957 = vadd.xlane.f32.xlu0 %v1956_v37  ;;  %v2342_v37 = vld [vmem:[%s2978_s11] ss:$0 sm:$0xff] }
 0xd29   : > { %1960 = vadd.xlane.f32.xlu0 %v1959_v4  ;;  %v2343_v4 = vld [vmem:[%s2979_s12] ss:$0 sm:$0xff] }
 0xdae   : > { %v1958_v13 = vpop.xlane.xlu0 %1957 }
 0xdaf   : > { %v1962_v60 = vmul.f32 0.03125, %v1958_v13 }
 0xdb1   : > { %v1964_v45 = vadd.f32 1e-05, %v1962_v60 }
 0xdb2   : > { %v1961_v46 = vpop.xlane.xlu0 %1960 }
 0xdb3   : > { %2570 = vrsqrt.f32 %v1964_v45  ;;  %v1963_v47 = vmul.f32 0.03125, %v1961_v46 }
 0xdb5   : > { %v1965_v48 = vadd.f32 1e-05, %v1963_v47 }
 0xdb7   : > { %2572 = vrsqrt.f32 %v1965_v48 }
 0xdc0   : > { %v2571_v49 = vpop.eup %2570 }
 0xdc1   : > { %v1968_v51 = vmul.f32 %v2571_v49, %v1952_v2 }
 0xdc3   : > { %v1977_v53 = vmul.f32 %v2334_v50, %v1968_v51 }
 0xdc4   : > { %v2573_v54 = vpop.eup %2572 }
 0xdc5   : > { %v1969_v55 = vmul.f32 %v2573_v54, %v1953_v35  ;;  %v1986_v56 = vadd.f32 %v2335_v52, %v1977_v53 }
 0xdc7   : > { %v1978_v57 = vmul.f32 %v2334_v50, %v1969_v55  ;;  %2504 = vmatprep.mubr.msk.f32.mxu0 %vm527_vm0, %v1986_v56 }
 0xdc9   : > { %v1987_v58 = vadd.f32 %v2335_v52, %v1978_v57 }
 0xdcb   : > { %2505 = vmatmul.mubr.msk.f32.vlgmr.msra.gmra.mxu0 %vm527_vm0, %v1987_v58 }
 0xe8b   : > { %v2506_v63 = vpop.f32.mrf.mxu0 }
 0xe8c   : > { %v2077_v28 = vadd.f32 %v2506_v63, %v2336_v62 }
 0xe8d   : > { %v2071_v30 = vpop.f32.mrf.mxu0 }
 0xe8e   : > { %v2072_v1 = vadd.f32 %v2336_v62, %v2071_v30  ;;  %v2081_v6 = vmax.f32 %v2077_v28, 0.0 }
 0xe90   : > { %v2080_v3 = vmax.f32 %v2072_v1, 0.0 }
 0xe92   : > { %2523 = vmatprep.mubr.msk.f32.mxu1 %vm2097_vm7, %v2080_v3 }
 0xe93   : > { %2524 = vmatmul.mubr.msk.f32.vlgmr.msra.gmra.mxu1 %vm2097_vm7, %v2081_v6 }
 0xf53   : > { %v2525_v7 = vpop.f32.mrf.mxu1 }
 0xf54   : > { %v2176_v10 = vadd.f32 %v2525_v7, %v2339_v8 }
 0xf55   : > { %v2170_v9 = vpop.f32.mrf.mxu1 }
 0xf56   : > { %v2171_v12 = vadd.f32 %v2339_v8, %v2170_v9  ;;  %v2180_v17 = vadd.f32 %v2176_v10, %v1987_v58 }
 0xf58   : > { %v2179_v0 = vadd.f32 %v2171_v12, %v1986_v56  ;;  %v2184_v11 = vsel %vm1945_vm6, %v2180_v17, 0.0 }
 0xf5a   : > { %v2181_v14 = vsel %vm527_vm0, %v2179_v0, 0.0 }
 0xf5b   : > { %2182 = vadd.xlane.f32.xlu0 %v2181_v14 }
 0xf5f   : > { %2185 = vadd.xlane.f32.xlu0 %v2184_v11 }
 0xfe4   : > { %v2183_v18 = vpop.xlane.xlu0 %2182 }
 0xfe5   : > { %v2187_v19 = vmul.f32 0.03125, %v2183_v18 }
 0xfe7   : > { %v2189_v20 = vsub.f32 %v2179_v0, %v2187_v19 }
 0xfe8   : > { %v2186_v21 = vpop.xlane.xlu0 %2185 }
 0xfe9   : > { %v2188_v22 = vmul.f32 0.03125, %v2186_v21  ;;  %v2191_v23 = vmul.f32 %v2189_v20, %v2189_v20 }
 0xfeb   : > { %v2190_v24 = vsub.f32 %v2180_v17, %v2188_v22  ;;  %v2193_v25 = vsel %vm527_vm0, %v2191_v23, 0.0 }
 0xfec   : > { %2194 = vadd.xlane.f32.xlu0 %v2193_v25 }
 0xfed   : > { %v2192_v26 = vmul.f32 %v2190_v24, %v2190_v24 }
 0xfef   : > { %v2196_v27 = vsel %vm1945_vm6, %v2192_v26, 0.0 }
 0xff0   : > { %2197 = vadd.xlane.f32.xlu0 %v2196_v27 }
0x1075   : > { %v2195_v31 = vpop.xlane.xlu0 %2194 }
0x1076   : > { %v2199_v32 = vmul.f32 0.03125, %v2195_v31 }
0x1078   : > { %v2201_v33 = vadd.f32 1e-05, %v2199_v32 }
0x1079   : > { %v2198_v34 = vpop.xlane.xlu0 %2197 }
0x107a   : > { %2574 = vrsqrt.f32 %v2201_v33  ;;  %v2200_v35 = vmul.f32 0.03125, %v2198_v34 }
0x107c   : > { %v2202_v2 = vadd.f32 1e-05, %v2200_v35 }
0x107e   : > { %2576 = vrsqrt.f32 %v2202_v2 }
0x1087   : > { %v2575_v36 = vpop.eup %2574 }
0x1088   : > { %v2205_v38 = vmul.f32 %v2575_v36, %v2189_v20 }
0x108a   : > { %v2214_v5 = vmul.f32 %v2342_v37, %v2205_v38 }
0x108b   : > { %v2577_v39 = vpop.eup %2576 }
0x108c   : > { %v2223_v40 = vadd.f32 %v2343_v4, %v2214_v5  ;;  %v2206_v41 = vmul.f32 %v2577_v39, %v2190_v24 }
0x108e   : > { %2225 = vst.msk [vmem:[%s440_s28] sm:$0xff] %vm527_vm0, %v2223_v40  ;;  %v2215_v42 = vmul.f32 %v2342_v37, %v2206_v41 }
0x1090   : > { %v2224_v43 = vadd.f32 %v2343_v4, %v2215_v42 }
0x1092   : > { %2226 = vst.msk [vmem:[%s440_s28 + $0x8] sm:$0xf] %vm1945_vm6, %v2224_v43 }
0x1093 PF: > { %s23_s25 = sadd.s32 1, %s2584_s25  }
0x1094   : > { %p20_p4 = scmp.ge.s32.totalorder %s23_s25, 4  }
0x1096   :  { %22 = sbr.rel (!%p20_p4) target bundleno = 1 (0x1), region = 102 }

</bundles_post_ra>
